<compile_context>
chip_gen: v6e
topology: v6e:2x2x1
jax: 0.10.0
libtpu: 0.0.40
codegen_flags: <defaults>
</compile_context>

<pallas_src>
import functools

import jax
import jax.numpy as jnp
from jax.experimental import pallas as pl
from jax.experimental.pallas import tpu as pltpu


def _cos_act_kernel(x_ref, o_ref, *, scale):
    # Pure elementwise hot path. Upcast to f32 before cos (no-op for f32 I/O,
    # keeps bf16/f16 inputs accurate); fuse the scalar scale into the store.
    # NOTE: jnp.cos lowers to VALU range-reduction + polynomial (not EUP), so
    # on v7x this is VALU-bound; kept in f32 for exact reference semantics.
    x = x_ref[...].astype(jnp.float32)
    o_ref[...] = (scale * jnp.cos(x)).astype(o_ref.dtype)


def cos_act(x, *, target_block_bytes=4 << 20, min_grid=8):
    """y = sqrt(2 / x.shape[1]) * cos(x); same shape & dtype as x."""
    D = x.shape[1]
    scale = float((2.0 / D) ** 0.5)

    orig_shape = x.shape
    n = x.size
    dtype = x.dtype
    itemsize = jnp.dtype(dtype).itemsize

    # Lane-dense slab width that divides the total element count: no jnp.pad
    # and no tail slice in the wrapper (each would cost an extra HBM pass on a
    # memory-bound op). Contiguous reshape is free.
    lane = 0
    for cand in (4096, 2048, 1024, 512, 256, 128):
        if n % cand == 0:
            lane = cand
            break
    if lane == 0:
        # Rare for NCHW tensors (size not divisible by 128): plain JAX is
        # correct and cheaper than a pad + slice round trip.
        return (scale * jnp.cos(x.astype(jnp.float32))).astype(dtype)

    rows = n // lane
    x2d = x.reshape(rows, lane)  # contiguous reshape: no copy

    # dtype-aware sublane multiple: 8 (f32), 16 (bf16/f16), 32 (int8/fp8).
    sub = max(8, 32 // itemsize)

    if rows <= sub:
        # Tiny tensor: single full-extent block (legal even if rows % 8 != 0).
        block_rows = rows
    else:
        # VMEM cap: ~4 MiB per block; 4 buffers (in+out double-buffered) =
        # 16 MiB, within the 32 MiB vmem_limit set below on every generation.
        cap = max(sub, (target_block_bytes // (lane * itemsize)) // sub * sub)
        # Megacore: aim for >= min_grid (~8) grid steps so the "parallel" axis
        # shards across v7x's two TensorCores; never go below `sub` rows.
        want = max(sub, (rows // min_grid) // sub * sub)
        block_rows = max(sub, min(cap, want))

    grid = (pl.cdiv(rows, block_rows),)  # partial last block is masked by Pallas
    kernel = functools.partial(_cos_act_kernel, scale=scale)

    out2d = pl.pallas_call(
        kernel,
        out_shape=jax.ShapeDtypeStruct((rows, lane), dtype),
        grid=grid,
        in_specs=[pl.BlockSpec((block_rows, lane), lambda i: (i, 0))],
        out_specs=pl.BlockSpec((block_rows, lane), lambda i: (i, 0)),
        compiler_params=pltpu.CompilerParams(
            dimension_semantics=("parallel",),   # megacore sharding on v7x
            vmem_limit_bytes=32 << 20,           # headroom for 4 MiB blocks on v5e too
        ),
    )(x2d)

    return out2d.reshape(orig_shape)


if __name__ == "__main__":
    key = jax.random.PRNGKey(0)
    x = jax.random.normal(key, (2, 4, 16, 16), dtype=jnp.float32)

    y = jax.block_until_ready(cos_act(x))

    # Reference check (plain JAX).
    D = x.shape[1]
    y_ref = (2.0 / D) ** 0.5 * jnp.cos(x)
    assert y.shape == x.shape and y.dtype == x.dtype
    assert jnp.allclose(y, y_ref, atol=1e-6, rtol=1e-6)

    # Also check a larger, multi-block case exercising the megacore-friendly grid.
    x2 = jax.random.normal(jax.random.PRNGKey(1), (4, 32, 64, 64), dtype=jnp.float32)
    y2 = jax.block_until_ready(cos_act(x2))
    y2_ref = (2.0 / x2.shape[1]) ** 0.5 * jnp.cos(x2)
    assert jnp.allclose(y2, y2_ref, atol=1e-6, rtol=1e-6)

    print("KERNEL_OK")
</pallas_src>

<mosaic_0001>
module attributes {stable_mosaic.version = 11 : i64} {
  func.func @_cos_act_kernel(%arg0: i32, %arg1: memref<1x2048xf32, #tpu.memory_space<vmem>>, %arg2: memref<1x2048xf32, #tpu.memory_space<vmem>>) attributes {dimension_semantics = [#tpu.dimension_semantics<parallel>], iteration_bounds = array<i64: 1>, scalar_prefetch = 0 : i64, scratch_operands = 0 : i64, tpu.core_type = #tpu.core_type<tc>, window_params = [{transform_indices = @transform_0, window_bounds = array<i64: 1, 2048>}, {transform_indices = @transform_1, window_bounds = array<i64: 1, 2048>}]} {
    %c0 = arith.constant 0 : index
    %c0_0 = arith.constant 0 : index
    %0 = vector.load %arg1[%c0, %c0_0] : memref<1x2048xf32, #tpu.memory_space<vmem>>, vector<1x2048xf32>
    %1 = math.cos %0 : vector<1x2048xf32>
    %cst = arith.constant 0.707106769 : f32
    %2 = vector.broadcast %cst : f32 to vector<1x2048xf32>
    %3 = arith.mulf %2, %1 : vector<1x2048xf32>
    %c0_1 = arith.constant 0 : index
    %c0_2 = arith.constant 0 : index
    %4 = vector.load %arg2[%c0_1, %c0_2] : memref<1x2048xf32, #tpu.memory_space<vmem>>, vector<1x2048xf32>
    tpu.vector_store %arg2[%c0_1, %c0_2], %3 {strides = array<i32>} : memref<1x2048xf32, #tpu.memory_space<vmem>>, vector<1x2048xf32>,
    return
  }
  func.func @transform_0(%arg0: i32) -> (i32, i32) {
    %c0_i32 = arith.constant 0 : i32
    %c0_i32_0 = arith.constant 0 : i32
    return %arg0, %c0_i32 : i32, i32
  }
  func.func @transform_1(%arg0: i32) -> (i32, i32) {
    %c0_i32 = arith.constant 0 : i32
    %c0_i32_0 = arith.constant 0 : i32
    return %arg0, %c0_i32 : i32, i32
  }
}

</mosaic_0001>

<bundles_post_ra>
// kernel: tpu_custom_call.1
= control target key start
LH: loop header
LB: loop body
LE: loop exit
PB: predicated region body
PF: predicated region fallthrough
CT: control target
= control target key end

     0   :  { %6 = vsyncpa [#allocation3], 0  ;;  %s434_s0 = inlined_call_operand.hbm [shape: f32[1,2048], index: 0, kind: input, shape index: {}]   ;;  %s435_s1 = inlined_call_operand.hbm [shape: f32[1,2048], index: 1, kind: output, shape index: {}]  }
   0x1   :  { %7 = vsyncpa [#allocation4], 0  ;;  %s324_s6 = smov [#allocation2]  }
   0x2   :  { %s14_s7 = sshll.u32 %s324_s6, 4  ;;  %s15_s7 = int_to_ptr.vmem [resolvable:$true] %s14_s7 }
   0x3   :  { %s288_s8 = scalar_lea.vmem %s15_s7, 256  ;;  %p293_p1 = scmp.lt.s32.totalorder %s15_s7, %s15_s7 }
   0x4   :  { %p289_p0 = scmp.ne.s32.totalorder %s15_s7, %s288_s8  ;;  %p294_p2 = scmp.lt.s32.totalorder %s288_s8, %s288_s8 }
   0x6   :  { %p295_p3 = por %p294_p2, %p293_p1 }
   0x8   :  { %p296_p4 = pnand %p295_p3, %p289_p0 }
   0xa   :  { %299 = shalt.err (!%p296_p4)
}
   0xb   :  { %17 = dma.hbm_to_vmem [thread:$0]  %s434_s0, 256, %s15_s7, [#allocation3]  }
   0xc   :  { %320 = dma.done.wait [#allocation3], 256  }
   0xd   :  { %321 = vsyncadd [#allocation3], 4294967040  ;;  %v345_v0 = vld [vmem:[#allocation2] sm:$0xff]  ;;  %v347_v1 = vld [vmem:[#allocation2 + $0x8] sm:$0xff]  ;;  %v325_v24 = vmov 683565275  }
   0xe   :  { %v23_v2 = vand.u32 2147483647, %v345_v0  ;;  %v26_v3 = vand.u32 2139095040, %v345_v0  ;;  %v126_v4 = vand.u32 2147483647, %v347_v1  ;;  %v129_v5 = vand.u32 2139095040, %v347_v1 }
   0xf   :  { %v326_v26 = vmov 2475754826   ;;  %v327_v28 = vmov 2131351028   ;;  %v328_v30 = vmov 2102212464  }
  0x10   :  { %v27_v6 = vshrl.u32 %v26_v3, 23  ;;  %v30_v7 = vand.u32 8388607, %v23_v2  ;;  %v130_v8 = vshrl.u32 %v129_v5, 23  ;;  %v133_v9 = vand.u32 8388607, %v126_v4 }
  0x11   :  { %v329_v32 = vmov 920167782   ;;  %v330_v40 = vmov 1326507024   ;;  %vm25_vm14 = vcmp.lt.s32.totalorder %v345_v0, 0  ;;  %s331_s0 = smov [#allocation5]  }
  0x12   :  { %v248_v10 = vadd.s32 4294967169, %v27_v6  ;;  %v252_v11 = vadd.s32 4294967169, %v130_v8  ;;  %v31_v13 = vor.u32 8388608, %v30_v7  ;;  %v134_v14 = vor.u32 8388608, %v133_v9  ;;  %s239_s11 = sshll.u32 %s331_s0, 4  ;;  %s240_s11 = int_to_ptr.vmem [resolvable:$true] %s239_s11 }
  0x13   :  { %vm408_vm15 = vcmp.le.f32.partialorder %v23_v2, 0.7853982  ;;  %s300_s12 = scalar_lea.vmem %s240_s11, 256  ;;  %p305_p6 = scmp.lt.s32.totalorder %s240_s11, %s240_s11 }
  0x14   :  { %v33_v12 = vadd.s32 1, %v248_v10  ;;  %v136_v15 = vadd.s32 1, %v252_v11  ;;  %v357_v20 = vshll.u32 %v31_v13, 8  ;;  %v359_v22 = vshll.u32 %v134_v14, 8  ;;  %p301_p5 = scmp.ne.s32.totalorder %s240_s11, %s300_s12  ;;  %p306_p7 = scmp.lt.s32.totalorder %s300_s12, %s300_s12 }
  0x16   :  { %vm34_vm0 = vcmp.gt.s32.totalorder %v33_v12, 0  ;;  %vm137_vm1 = vcmp.gt.s32.totalorder %v136_v15, 0  ;;  %p307_p8 = por %p306_p7, %p305_p6 }
  0x17   :  { %v35_v16 = vsel %vm34_vm0, %v33_v12, 0  ;;  %v138_v19 = vsel %vm137_vm1, %v136_v15, 0  ;;  %vm128_vm0 = vcmp.lt.s32.totalorder %v347_v1, 0  ;;  %vm418_vm1 = vcmp.le.f32.partialorder %v126_v4, 0.7853982 }
  0x18   :  { %v36_v17 = vshrl.u32 %v35_v16, 5  ;;  %v37_v18 = vand.u32 31, %v35_v16  ;;  %v140_v21 = vand.u32 31, %v138_v19  ;;  %v361_v34 = vshrl.u32 %v138_v19, 5  ;;  %p308_p9 = pnand %p307_p8, %p301_p5 }
  0x1a   :  { %v38_v23 = vsub.s32 32, %v37_v18  ;;  %v40_v25 = vshll.u32 %v325_v24, %v37_v18  ;;  %v43_v27 = vshll.u32 %v326_v26, %v37_v18  ;;  %v46_v29 = vshll.u32 %v327_v28, %v37_v18 }
  0x1b   :  { %v49_v31 = vshll.u32 %v328_v30, %v37_v18  ;;  %v52_v33 = vshll.u32 %v329_v32, %v37_v18  ;;  %vm55_vm2 = vcmp.lt.s32.totalorder %v36_v17, 1  ;;  %vm56_vm3 = vcmp.lt.s32.totalorder %v36_v17, 2 }
  0x1c   :  { %v39_v35 = vshrl.u32 %v325_v24, %v38_v23  ;;  %v41_v36 = vshrl.u32 %v326_v26, %v38_v23  ;;  %v44_v37 = vshrl.u32 %v327_v28, %v38_v23  ;;  %v47_v38 = vshrl.u32 %v328_v30, %v38_v23 }
  0x1d   :  { %v50_v39 = vshrl.u32 %v329_v32, %v38_v23  ;;  %v53_v41 = vshrl.u32 %v330_v40, %v38_v23  ;;  %vm58_vm4 = vcmp.lt.s32.totalorder %v36_v17, 4  ;;  %v141_v45 = vsub.s32 32, %v140_v21 }
  0x1e   :  { %v42_v42 = vor.u32 %v41_v36, %v40_v25  ;;  %v45_v43 = vor.u32 %v44_v37, %v43_v27  ;;  %v48_v44 = vor.u32 %v47_v38, %v46_v29  ;;  %vm57_vm5 = vcmp.lt.s32.totalorder %v36_v17, 3 }
  0x1f   :  { %v51_v46 = vor.u32 %v50_v39, %v49_v31  ;;  %v54_v47 = vor.u32 %v53_v41, %v52_v33  ;;  %v143_v48 = vshll.u32 %v325_v24, %v140_v21  ;;  %v146_v56 = vshll.u32 %v326_v26, %v140_v21 }
  0x20   :  { %v59_v49 = vsel %vm55_vm2, %v39_v35, %v42_v42  ;;  %v60_v50 = vsel %vm58_vm4, %v48_v44, 2102212464  ;;  %v63_v51 = vsel %vm55_vm2, %v42_v42, %v45_v43  ;;  %v67_v52 = vsel %vm55_vm2, %v45_v43, %v48_v44 }
  0x21   :  { %v61_v53 = vsel %vm57_vm5, %v45_v43, %v60_v50  ;;  %v64_v54 = vsel %vm58_vm4, %v51_v46, 920167782  ;;  %v68_v55 = vsel %vm58_vm4, %v54_v47, 1326507024  ;;  %v142_v59 = vshrl.u32 %v325_v24, %v141_v45 }
  0x22   :  { %v65_v57 = vsel %vm57_vm5, %v48_v44, %v64_v54  ;;  %v69_v58 = vsel %vm57_vm5, %v51_v46, %v68_v55  ;;  %v144_v60 = vshrl.u32 %v326_v26, %v141_v45  ;;  %v62_v61 = vsel %vm56_vm3, %v59_v49, %v61_v53 }
  0x23   :  { %v66_v62 = vsel %vm56_vm3, %v63_v51, %v65_v57  ;;  %v70_v63 = vsel %vm56_vm3, %v67_v52, %v69_v58  ;;  %v147_v3 = vshrl.u32 %v327_v28, %v141_v45  ;;  %v149_v11 = vshll.u32 %v327_v28, %v140_v21 }
  0x24   :  { %v370_v5 = vmul.u32.u64.low %v357_v20, %v70_v63  ;;  %v371_v6 = vmul.u32.u64.high %v357_v20, %v70_v63, %v370_v5  ;;  %v374_v7 = vmul.u32.u64.low %v357_v20, %v66_v62  ;;  %v375_v8 = vmul.u32.u64.high %v357_v20, %v66_v62, %v374_v7 }
  0x25   :  { %v145_v9 = vor.u32 %v144_v60, %v143_v48  ;;  %v148_v10 = vor.u32 %v147_v3, %v146_v56  ;;  %v150_v12 = vshrl.u32 %v328_v30, %v141_v45  ;;  %v152_v13 = vshll.u32 %v328_v30, %v140_v21 }
  0x26   :  { %v153_v14 = vshrl.u32 %v329_v32, %v141_v45  ;;  %v155_v15 = vshll.u32 %v329_v32, %v140_v21  ;;  %v156_v16 = vshrl.u32 %v330_v40, %v141_v45  ;;  %v78_v17 = vmul.u32 %v357_v20, %v62_v61 }
  0x27   :  { %v151_v18 = vor.u32 %v150_v12, %v149_v11  ;;  %vm158_vm6 = vcmp.lt.s32.totalorder %v361_v34, 1  ;;  %vm159_vm7 = vcmp.lt.s32.totalorder %v361_v34, 2  ;;  %vm80_vm8 = vc.u32 %v371_v6, %v374_v7 }
  0x28   :  { %v81_v19 = vadd.s32 1, %v375_v8  ;;  %v154_v23 = vor.u32 %v153_v14, %v152_v13  ;;  %vm160_vm9 = vcmp.lt.s32.totalorder %v361_v34, 3  ;;  %v157_v24 = vor.u32 %v156_v16, %v155_v15 }
  0x29   :  { %vm161_vm10 = vcmp.lt.s32.totalorder %v361_v34, 4  ;;  %v162_v25 = vsel %vm158_vm6, %v142_v59, %v145_v9  ;;  %v166_v21 = vsel %vm158_vm6, %v145_v9, %v148_v10  ;;  %v170_v28 = vsel %vm158_vm6, %v148_v10, %v151_v18 }
  0x2a   :  { %v82_v26 = vsel %vm80_vm8, %v81_v19, %v375_v8  ;;  %v163_v20 = vsel %vm161_vm10, %v151_v18, 2102212464  ;;  %v167_v27 = vsel %vm161_vm10, %v154_v23, 920167782  ;;  %v171_v32 = vsel %vm161_vm10, %v157_v24, 1326507024 }
  0x2b   :  { %v83_v29 = vadd.s32 %v82_v26, %v78_v17  ;;  %v164_v30 = vsel %vm160_vm9, %v148_v10, %v163_v20  ;;  %v168_v31 = vsel %vm160_vm9, %v151_v18, %v167_v27  ;;  %v172_v36 = vsel %vm160_vm9, %v154_v23, %v171_v32 }
  0x2c   :  { %v165_v33 = vsel %vm159_vm7, %v162_v25, %v164_v30  ;;  %v169_v35 = vsel %vm159_vm7, %v166_v21, %v168_v31  ;;  %v173_v38 = vsel %vm159_vm7, %v170_v28, %v172_v36  ;;  %v79_v57 = vadd.s32 %v374_v7, %v371_v6 }
  0x2d   :  { %v84_v37 = vadd.s32 536870912, %v83_v29  ;;  %v392_v39 = vmul.u32.u64.low %v359_v22, %v169_v35  ;;  %v393_v40 = vmul.u32.u64.high %v359_v22, %v169_v35, %v392_v39  ;;  %v181_v44 = vmul.u32 %v359_v22, %v165_v33 }
  0x2e   :  { %v396_v41 = vmul.u32.u64.low %v359_v22, %v173_v38  ;;  %v397_v42 = vmul.u32.u64.high %v359_v22, %v173_v38, %v396_v41  ;;  %vm115_vm5 = vweird.f32 %v345_v0  ;;  %vm218_vm9 = vweird.f32 %v347_v1 }
  0x2f   :  { %v85_v43 = vshrl.u32 %v84_v37, 30  ;;  %v184_v46 = vadd.s32 1, %v393_v40 }
  0x30   :  { %vm183_vm11 = vc.u32 %v397_v42, %v392_v39  ;;  %v182_v13 = vadd.s32 %v392_v39, %v397_v42 }
  0x31   :  { %v86_v45 = vshll.u32 %v85_v43, 30  ;;  %v185_v34 = vsel %vm183_vm11, %v184_v46, %v393_v40  ;;  %v109_v20 = vsub.s32 4, %v85_v43 }
  0x32   :  { %v186_v48 = vadd.s32 %v185_v34, %v181_v44 }
  0x33   :  { %v87_v47 = vsub.s32 %v83_v29, %v86_v45  ;;  %v110_v31 = vsel %vm25_vm14, %v109_v20, %v85_v43 }
  0x34   :  { %v187_v50 = vadd.s32 536870912, %v186_v48  ;;  %v112_v35 = vsel %vm408_vm15, 0, %v110_v31 }
  0x35   :  { %v89_v49 = vsub.s32 0, %v87_v47  ;;  %v116_v39 = vand.u32 3, %v112_v35 }
  0x36   :  { %v188_v52 = vshrl.u32 %v187_v50, 30 }
  0x37   :  { %v249_v51 = vmin.u32 %v89_v49, %v87_v47  ;;  %vm121_vm2 = vcmp.eq.s32.totalorder %v116_v39, 2  ;;  %vm118_vm3 = vcmp.eq.s32.totalorder %v116_v39, 0  ;;  %vm117_vm4 = vcmp.lt.s32.totalorder %v116_v39, 2 }
  0x38   :  { %v189_v54 = vshll.u32 %v188_v52, 30  ;;  %v212_v37 = vsub.s32 4, %v188_v52 }
  0x39   :  { %v91_v53 = vclz %v249_v51 }
  0x3a   :  { %v190_v56 = vsub.s32 %v186_v48, %v189_v54  ;;  %v213_v40 = vsel %vm128_vm0, %v212_v37, %v188_v52 }
  0x3b   :  { %v250_v55 = vadd.s32 4294967294, %v91_v53  ;;  %v215_v44 = vsel %vm418_vm1, 0, %v213_v40 }
  0x3c   :  { %v192_v58 = vsub.s32 0, %v190_v56  ;;  %v219_v34 = vand.u32 3, %v215_v44 }
  0x3d   :  { %vm251_vm12 = vcmp.lt.s32.totalorder %v250_v55, 0 }
  0x3e   :  { %v94_v22 = vsel %vm251_vm12, 0, %v250_v55  ;;  %v253_v62 = vmin.u32 %v192_v58, %v190_v56  ;;  %vm224_vm6 = vcmp.eq.s32.totalorder %v219_v34, 2  ;;  %vm221_vm7 = vcmp.eq.s32.totalorder %v219_v34, 0 }
  0x3f   :  { %v95_v59 = vsub.s32 32, %v94_v22  ;;  %v96_v60 = vshll.u32 %v87_v47, %v94_v22  ;;  %v99_v61 = vsub.s32 4294967266, %v94_v22  ;;  %vm220_vm8 = vcmp.lt.s32.totalorder %v219_v34, 2 }
  0x40   :  { %v194_v5 = vclz %v253_v62 }
  0x41   :  { %v97_v63 = vshrl.u32 %v79_v57, %v95_v59  ;;  %v100_v3 = vadd.s32 127, %v99_v61 }
  0x42   :  { %v254_v10 = vadd.s32 4294967294, %v194_v5 }
  0x43   :  { %v98_v8 = vor.u32 %v97_v63, %v96_v60  ;;  %v101_v9 = vshll.u32 %v100_v3, 23 }
  0x44   :  { %vm255_vm13 = vcmp.lt.s32.totalorder %v254_v10, 0 }
  0x45   :  { %v102_v11 = vor.u32 4788187, %v101_v9  ;;  %v105_v12 = vcvt.s32.f32 %v98_v8  ;;  %v197_v6 = vsel %vm255_vm13, 0, %v254_v10 }
  0x46   :  { %v198_v7 = vsub.s32 32, %v197_v6  ;;  %v199_v15 = vshll.u32 %v190_v56, %v197_v6  ;;  %v202_v16 = vsub.s32 4294967266, %v197_v6 }
  0x47   :  { %v103_v14 = vand.u32 2147483647, %v102_v11 }
  0x48   :  { %v200_v18 = vshrl.u32 %v182_v13, %v198_v7  ;;  %v203_v19 = vadd.s32 127, %v202_v16 }
  0x49   :  { %v106_v17 = vmul.f32 %v105_v12, %v103_v14 }
  0x4a   :  { %v201_v25 = vor.u32 %v200_v18, %v199_v15  ;;  %v204_v21 = vshll.u32 %v203_v19, 23 }
  0x4b   :  { %v107_v24 = vxor.u32 2147483648, %v106_v17 }
  0x4c   :  { %v205_v28 = vor.u32 4788187, %v204_v21  ;;  %v208_v29 = vcvt.s32.f32 %v201_v25 }
  0x4d   :  { %v108_v26 = vsel %vm25_vm14, %v107_v24, %v106_v17 }
  0x4e   :  { %v111_v27 = vsel %vm408_vm15, %v345_v0, %v108_v26  ;;  %v206_v30 = vand.u32 2147483647, %v205_v28 }
  0x4f   :  { %272 = vcosq.f32 %v111_v27 }
  0x50   :  { %274 = vsinq.f32 %v111_v27  ;;  %v209_v32 = vmul.f32 %v208_v29, %v206_v30 }
  0x52   :  { %v210_v33 = vxor.u32 2147483648, %v209_v32 }
  0x54   :  { %v211_v36 = vsel %vm128_vm0, %v210_v33, %v209_v32 }
  0x55   :  { %v214_v38 = vsel %vm418_vm1, %v347_v1, %v211_v36 }
  0x56   :  { %276 = vcosq.f32 %v214_v38 }
  0x57   :  { %278 = vsinq.f32 %v214_v38 }
  0x5c   :  { %v273_v41 = vpop.eup %272 }
  0x5d   :  { %v275_v4 = vpop.eup %274  ;;  %v122_v42 = vxor.u32 2147483648, %v273_v41 }
  0x5e   :  { %v119_v43 = vxor.u32 2147483648, %v275_v4 }
  0x5f   :  { %v123_v45 = vsel %vm121_vm2, %v122_v42, %v275_v4 }
  0x60   :  { %v120_v46 = vsel %vm118_vm3, %v273_v41, %v119_v43 }
  0x61   :  { %v124_v47 = vsel %vm117_vm4, %v120_v46, %v123_v45 }
  0x62   :  { %v125_v48 = vsel %vm115_vm5, nan, %v124_v47 }
  0x63   :  { %v229_v49 = vmul.f32 0.70710677, %v125_v48  ;;  %v277_v50 = vpop.eup %276 }
  0x64   :  { %v279_v51 = vpop.eup %278  ;;  %v225_v52 = vxor.u32 2147483648, %v277_v50 }
  0x65   :  { %231 = vst [vmem:[#allocation5] sm:$0xff] %v229_v49  ;;  %v222_v53 = vxor.u32 2147483648, %v279_v51 }
  0x66   :  { %v226_v54 = vsel %vm224_vm6, %v225_v52, %v279_v51 }
  0x67   :  { %v223_v55 = vsel %vm221_vm7, %v277_v50, %v222_v53 }
  0x68   :  { %v227_v0 = vsel %vm220_vm8, %v223_v55, %v226_v54 }
  0x69   :  { %v228_v56 = vsel %vm218_vm9, nan, %v227_v0 }
  0x6a   :  { %v230_v57 = vmul.f32 0.70710677, %v228_v56 }
  0x6c   :  { %232 = vst [vmem:[#allocation5 + $0x8] sm:$0xff] %v230_v57 }
  0x6d   :  { %311 = shalt.err (!%p308_p9)
}
  0x6e   :  { %242 = dma.vmem_to_hbm [thread:$0]  %s240_s11, 256, %s435_s1, [#allocation4]  }
  0x6f   :  { %322 = dma.done.wait [#allocation4], 256  }
  0x70   :  { %323 = vsyncadd [#allocation4], 4294967040 }
  0x71   :  { %246 = vsyncpa [#allocation3], 1 }
  0x72   :  { %247 = vsyncpa [#allocation4], 1 }

</bundles_post_ra>
